<compile_context>
chip_gen: v5e
topology: v5e:2x2
jax: 0.10.0
libtpu: 0.0.40
codegen_flags: <defaults>
</compile_context>

<pallas_src>
import functools
import math

import jax
import jax.numpy as jnp
from jax.experimental import pallas as pl
from jax.experimental.pallas import tpu as pltpu

_LANE = 128
_SUBLANE = 8
_MIB = 2 ** 20


def _round_up(x, m):
    return (x + m - 1) // m * m


def _vmem_capacity_bytes():
    """Physical VMEM per TensorCore (128 MiB v5e/v6e, 64 MiB v7x)."""
    try:
        cap = getattr(pltpu.get_tpu_info(), "vmem_capacity_bytes", None)
        if cap:
            return int(cap)
    except Exception:
        pass
    return 64 * _MIB  # conservative default (v7x-sized)


# ---------------------------------------------------------------------------
# Kernels
# ---------------------------------------------------------------------------

def _ffn_resident_kernel(x_ref, w1_ref, b1_ref, w2_ref, b2_ref, o_ref,
                         *, hc, n_chunks, compute_dtype):
    """Single-pass FFN: both (padded) weight slabs are VMEM-resident.

    d_ff is walked in `n_chunks` static sub-chunks of `hc` columns so the h
    intermediate never exceeds (tm, hc) f32; no accumulator scratch, no RMW.
    """
    x = x_ref[...].astype(compute_dtype)      # cast on the VPU, hidden under MXU
    tm = x.shape[0]
    dm_p = o_ref.shape[-1]
    acc = jnp.zeros((tm, dm_p), jnp.float32)
    for c in range(n_chunks):                 # static unroll, static ref slices
        lo = c * hc
        h = jnp.dot(x, w1_ref[:, lo:lo + hc], preferred_element_type=jnp.float32)
        h = jnp.maximum(h + b1_ref[:, lo:lo + hc], 0.0)
        # dropout == identity (eval mode).
        acc = acc + jnp.dot(h.astype(compute_dtype), w2_ref[lo:lo + hc, :],
                            preferred_element_type=jnp.float32)
    o_ref[...] = (acc + b2_ref[...]).astype(o_ref.dtype)


def _ffn_chunked_kernel(x_ref, w1_ref, b1_ref, w2_ref, b2_ref, o_ref, acc_ref,
                        *, compute_dtype):
    """d_ff-chunked FFN: grid axis 1 walks d_ff chunks; f32 VMEM accumulator."""
    j = pl.program_id(1)

    @pl.when(j == 0)
    def _():
        acc_ref[...] = jnp.zeros_like(acc_ref)

    x = x_ref[...].astype(compute_dtype)
    h = jnp.dot(x, w1_ref[...], preferred_element_type=jnp.float32)
    h = jnp.maximum(h + b1_ref[...], 0.0)
    # dropout == identity (eval mode).
    acc_ref[...] += jnp.dot(h.astype(compute_dtype), w2_ref[...],
                            preferred_element_type=jnp.float32)

    @pl.when(j == pl.num_programs(1) - 1)
    def _():
        o_ref[...] = (acc_ref[...] + b2_ref[...]).astype(o_ref.dtype)


# ---------------------------------------------------------------------------
# Wrapper
# ---------------------------------------------------------------------------

def make_positionwise_feed_forward(w1, b1, w2, b2, *, tm=None,
                                   compute_dtype=jnp.bfloat16):
    """Prepare (pad/cast ONCE) and return a jitted eval-mode FFN: x -> FFN(x).

    w1: [d_model, d_ff]   b1: [d_ff]
    w2: [d_ff, d_model]   b2: [d_model]
    """
    d_model, d_ff = w1.shape
    assert w2.shape == (d_ff, d_model)

    cbytes = jnp.dtype(compute_dtype).itemsize
    dm_p = _round_up(d_model, _LANE)
    dff_full = _round_up(d_ff, _LANE)

    vmem_cap = _vmem_capacity_bytes()
    big_vmem = vmem_cap >= 96 * _MIB                  # v5e / v6e (128 MiB parts)
    budget = max(vmem_cap - 12 * _MIB, 20 * _MIB)     # headroom for Mosaic scratch

    weight_bytes = 2 * dm_p * dff_full * cbytes
    resident_threshold = (48 if big_vmem else 12) * _MIB
    # Rough non-weight working set for the resident path at a 256-row probe.
    probe_tm = 256
    resident_misc = 5 * probe_tm * dm_p * 4 + probe_tm * min(dff_full, 512) * 4
    resident = (weight_bytes <= resident_threshold
                and weight_bytes + resident_misc <= budget)

    if resident:
        dff_p = dff_full
        k_steps = 1
        tff = dff_full
        # d_ff sub-chunk for the in-kernel loop (bounds the h intermediate).
        if dff_full <= 1024:
            hc = dff_full
        else:
            hc = next(c for c in (512, 256, 128) if dff_full % c == 0)
        n_chunks = dff_p // hc
        tm_default = 256
    else:
        pair_target = (16 if big_vmem else 4) * _MIB
        tff = max(512, pair_target // (2 * dm_p * cbytes) // _LANE * _LANE)
        tff = min(tff, dff_full)
        dff_p = _round_up(d_ff, tff)
        k_steps = dff_p // tff
        hc = n_chunks = None
        # Weight re-streaming scales with the number of row tiles; amortize it.
        tm_default = 512

    # --- pad & cast weights ONCE (zero padding contributes exactly 0) -------
    w1_p = jnp.pad(w1.astype(compute_dtype),
                   ((0, dm_p - d_model), (0, dff_p - d_ff)))
    b1_p = jnp.pad(b1.astype(jnp.float32), (0, dff_p - d_ff)).reshape(1, dff_p)
    w2_p = jnp.pad(w2.astype(compute_dtype),
                   ((0, dff_p - d_ff), (0, dm_p - d_model)))
    b2_p = jnp.pad(b2.astype(jnp.float32), (0, dm_p - d_model)).reshape(1, dm_p)

    tm_req = tm if tm is not None else tm_default

    def apply(x, w1_p, b1_p, w2_p, b2_p):
        assert x.shape[-1] == d_model
        lead_shape = x.shape[:-1]
        M = math.prod(lead_shape) if lead_shape else 1
        xbytes = jnp.dtype(x.dtype).itemsize
        obytes = xbytes

        # --- row tile --------------------------------------------------------
        tm_ = max(_SUBLANE,
                  min(_round_up(tm_req, _SUBLANE), _round_up(M, _SUBLANE)))
        # Keep >=2 row tiles so both v7x TensorCores get work on the "parallel"
        # axis (only ~0.35us extra on single-TC parts).
        if M > _SUBLANE and pl.cdiv(M, tm_) < 2:
            tm_ = _round_up(pl.cdiv(M, 2), _SUBLANE)

        def vmem_est(t):
            est = (2 * t * dm_p * xbytes            # x tiles (double-buffered)
                   + 2 * t * dm_p * obytes          # out tiles
                   + t * dm_p * 4)                  # f32 accumulator
            if resident:
                est += (weight_bytes + dff_p * 4 + dm_p * 4   # single-buffered weights
                        + t * hc * 4)                         # h sub-chunk
            else:
                est += (2 * 2 * dm_p * tff * cbytes           # W1+W2 blocks (dbl-buf)
                        + 2 * tff * 4 + dm_p * 4              # biases
                        + t * tff * 4)                        # h intermediate
            return est

        while tm_ > 64 and vmem_est(tm_) > budget:
            tm_ = _round_up(tm_ // 2, _SUBLANE)

        num_m = pl.cdiv(M, tm_)
        vmem_limit = int(min(max(vmem_est(tm_) + 16 * _MIB, 32 * _MIB), budget))

        # --- x: no wrapper cast; pad the feature dim only if not lane-dense ---
        x2d = x.reshape(M, d_model)
        if dm_p != d_model:
            x2d = jnp.pad(x2d, ((0, 0), (0, dm_p - d_model)))
        # A partial last row tile (M % tm_) is handled by Pallas block padding:
        # garbage rows only produce garbage output rows beyond M (never read).

        cost = pl.CostEstimate(
            flops=4 * M * dm_p * dff_p,
            transcendentals=0,
            bytes_accessed=int(M * dm_p * xbytes + weight_bytes
                               + dff_p * 4 + dm_p * 4 + M * dm_p * obytes))

        if resident:
            kernel = functools.partial(_ffn_resident_kernel, hc=hc,
                                       n_chunks=n_chunks,
                                       compute_dtype=compute_dtype)
            invariant = pl.Buffered(1)   # grid-invariant => single-buffer
            grid_spec = pltpu.PrefetchScalarGridSpec(
                num_scalar_prefetch=0,
                grid=(num_m,),
                in_specs=[
                    pl.BlockSpec((tm_, dm_p), lambda i: (i, 0)),            # x rows
                    pl.BlockSpec((dm_p, dff_p), lambda i: (0, 0),
                                 pipeline_mode=invariant),                  # W1
                    pl.BlockSpec((1, dff_p), lambda i: (0, 0),
                                 pipeline_mode=invariant),                  # b1
                    pl.BlockSpec((dff_p, dm_p), lambda i: (0, 0),
                                 pipeline_mode=invariant),                  # W2
                    pl.BlockSpec((1, dm_p), lambda i: (0, 0),
                                 pipeline_mode=invariant),                  # b2
                ],
                out_specs=pl.BlockSpec((tm_, dm_p), lambda i: (i, 0)),
            )
            dim_sem = ("parallel",)
        else:
            kernel = functools.partial(_ffn_chunked_kernel,
                                       compute_dtype=compute_dtype)
            grid_spec = pltpu.PrefetchScalarGridSpec(
                num_scalar_prefetch=0,
                grid=(num_m, k_steps),
                in_specs=[
                    pl.BlockSpec((tm_, dm_p), lambda i, j: (i, 0)),         # x rows
                    pl.BlockSpec((dm_p, tff), lambda i, j: (0, j)),         # W1
                    pl.BlockSpec((1, tff), lambda i, j: (0, j)),            # b1
                    pl.BlockSpec((tff, dm_p), lambda i, j: (j, 0)),         # W2
                    pl.BlockSpec((1, dm_p), lambda i, j: (0, 0)),           # b2
                ],
                out_specs=pl.BlockSpec((tm_, dm_p), lambda i, j: (i, 0)),
                scratch_shapes=[pltpu.VMEM((tm_, dm_p), jnp.float32)],
            )
            dim_sem = ("parallel", "arbitrary")

        out_p = pl.pallas_call(
            kernel,
            out_shape=jax.ShapeDtypeStruct((M, dm_p), x.dtype),
            grid_spec=grid_spec,
            compiler_params=pltpu.CompilerParams(
                dimension_semantics=dim_sem,
                vmem_limit_bytes=vmem_limit),
            cost_estimate=cost,
        )(x2d, w1_p, b1_p, w2_p, b2_p)

        out = out_p if dm_p == d_model else out_p[:, :d_model]
        return out.reshape(lead_shape + (d_model,))

    jitted = jax.jit(apply)
    return lambda x: jitted(x, w1_p, b1_p, w2_p, b2_p)


def positionwise_feed_forward(x, w1, b1, w2, b2, *, tm=None,
                              compute_dtype=jnp.bfloat16):
    """One-off convenience wrapper (re-prepares weights on every call; prefer
    make_positionwise_feed_forward for repeated inference)."""
    return make_positionwise_feed_forward(
        w1, b1, w2, b2, tm=tm, compute_dtype=compute_dtype)(x)


if __name__ == "__main__":
    # Small shapes consistent with the module: batch=2, seq=8, d_model=32, d_ff=64.
    B, S, d_model, d_ff = 2, 8, 32, 64
    key = jax.random.PRNGKey(0)
    kx, k1, k2, k3, k4 = jax.random.split(key, 5)

    x = jax.random.normal(kx, (B, S, d_model), dtype=jnp.float32)

    # Deterministic parameter init mimicking nn.Linear defaults
    # (uniform in +/- 1/sqrt(fan_in)).  Stored pre-transposed for the kernel.
    lim1 = 1.0 / (d_model ** 0.5)
    lim2 = 1.0 / (d_ff ** 0.5)
    w1 = jax.random.uniform(k1, (d_model, d_ff), jnp.float32, -lim1, lim1)
    b1 = jax.random.uniform(k2, (d_ff,), jnp.float32, -lim1, lim1)
    w2 = jax.random.uniform(k3, (d_ff, d_model), jnp.float32, -lim2, lim2)
    b2 = jax.random.uniform(k4, (d_model,), jnp.float32, -lim2, lim2)

    # Plain-JAX eval-mode reference.
    ref = jnp.maximum(x @ w1 + b1, 0.0) @ w2 + b2

    # Exact-precision path (f32 compute) -- tight tolerance vs reference.
    out_f32 = positionwise_feed_forward(x, w1, b1, w2, b2,
                                        compute_dtype=jnp.float32)
    out_f32 = jax.block_until_ready(out_f32)
    assert out_f32.shape == (B, S, d_model)
    assert jnp.allclose(out_f32, ref, atol=1e-5, rtol=1e-5)

    # Fast path: prepared-weight callable (pad/cast hoisted), bf16 MXU inputs
    # with f32 accumulation.
    ffn = make_positionwise_feed_forward(w1, b1, w2, b2)
    out_bf16 = jax.block_until_ready(ffn(x))
    assert out_bf16.shape == (B, S, d_model)
    assert jnp.allclose(out_bf16, ref, atol=3e-2, rtol=3e-2)

    print("KERNEL_OK")
</pallas_src>

<mosaic_0001>
module attributes {stable_mosaic.version = 11 : i64} {
  func.func @_ffn_resident_kernel(%arg0: i32, %arg1: memref<8x128xf32, #tpu.memory_space<vmem>>, %arg2: memref<128x128xf32, #tpu.memory_space<vmem>>, %arg3: memref<1x128xf32, #tpu.memory_space<vmem>>, %arg4: memref<128x128xf32, #tpu.memory_space<vmem>>, %arg5: memref<1x128xf32, #tpu.memory_space<vmem>>, %arg6: memref<8x128xf32, #tpu.memory_space<vmem>>) attributes {dimension_semantics = [#tpu.dimension_semantics<parallel>], iteration_bounds = array<i64: 2>, scalar_prefetch = 0 : i64, scratch_operands = 0 : i64, tpu.core_type = #tpu.core_type<tc>, window_params = [{transform_indices = @transform_0, window_bounds = array<i64: 8, 128>}, {pipeline_mode = #tpu.pipeline_mode<synchronous>, transform_indices = @transform_1, window_bounds = array<i64: 128, 128>}, {pipeline_mode = #tpu.pipeline_mode<synchronous>, transform_indices = @transform_2, window_bounds = array<i64: 1, 128>}, {pipeline_mode = #tpu.pipeline_mode<synchronous>, transform_indices = @transform_3, window_bounds = array<i64: 128, 128>}, {pipeline_mode = #tpu.pipeline_mode<synchronous>, transform_indices = @transform_4, window_bounds = array<i64: 1, 128>}, {transform_indices = @transform_5, window_bounds = array<i64: 8, 128>}]} {
    %c0 = arith.constant 0 : index
    %c0_0 = arith.constant 0 : index
    %0 = vector.load %arg1[%c0, %c0_0] : memref<8x128xf32, #tpu.memory_space<vmem>>, vector<8x128xf32>
    %cst = arith.constant 0.000000e+00 : f32
    %1 = vector.broadcast %cst : f32 to vector<8x128xf32>
    %c0_1 = arith.constant 0 : index
    %c0_2 = arith.constant 0 : index
    %2 = vector.load %arg2[%c0_1, %c0_2] : memref<128x128xf32, #tpu.memory_space<vmem>>, vector<128x128xf32>
    %cst_3 = arith.constant dense<0.000000e+00> : vector<8x128xf32>
    %3 = tpu.matmul %0, %2, %cst_3 {dimension_numbers = #tpu.dot_dimension_numbers<[1], [0], [0], [1], [0, 0, 1, 1], [], []>} : vector<8x128xf32>, vector<128x128xf32>, vector<8x128xf32> -> vector<8x128xf32>
    %c0_4 = arith.constant 0 : index
    %c0_5 = arith.constant 0 : index
    %4 = vector.load %arg3[%c0_4, %c0_5] : memref<1x128xf32, #tpu.memory_space<vmem>>, vector<1x128xf32>
    %5 = vector.broadcast %4 : vector<1x128xf32> to vector<8x128xf32>
    %6 = arith.addf %3, %5 : vector<8x128xf32>
    %cst_6 = arith.constant 0.000000e+00 : f32
    %7 = vector.broadcast %cst_6 : f32 to vector<8x128xf32>
    %8 = arith.maximumf %6, %7 : vector<8x128xf32>
    %c0_7 = arith.constant 0 : index
    %c0_8 = arith.constant 0 : index
    %9 = vector.load %arg4[%c0_7, %c0_8] : memref<128x128xf32, #tpu.memory_space<vmem>>, vector<128x128xf32>
    %cst_9 = arith.constant dense<0.000000e+00> : vector<8x128xf32>
    %10 = tpu.matmul %8, %9, %cst_9 {dimension_numbers = #tpu.dot_dimension_numbers<[1], [0], [0], [1], [0, 0, 1, 1], [], []>} : vector<8x128xf32>, vector<128x128xf32>, vector<8x128xf32> -> vector<8x128xf32>
    %11 = arith.addf %1, %10 : vector<8x128xf32>
    %c0_10 = arith.constant 0 : index
    %c0_11 = arith.constant 0 : index
    %12 = vector.load %arg5[%c0_10, %c0_11] : memref<1x128xf32, #tpu.memory_space<vmem>>, vector<1x128xf32>
    %13 = vector.broadcast %12 : vector<1x128xf32> to vector<8x128xf32>
    %14 = arith.addf %11, %13 : vector<8x128xf32>
    %c0_12 = arith.constant 0 : index
    %c0_13 = arith.constant 0 : index
    %15 = vector.load %arg6[%c0_12, %c0_13] : memref<8x128xf32, #tpu.memory_space<vmem>>, vector<8x128xf32>
    tpu.vector_store %arg6[%c0_12, %c0_13], %14 {strides = array<i32>} : memref<8x128xf32, #tpu.memory_space<vmem>>, vector<8x128xf32>,
    return
  }
  func.func @transform_0(%arg0: i32) -> (i32, i32) {
    %c0_i32 = arith.constant 0 : i32
    %c0_i32_0 = arith.constant 0 : i32
    return %arg0, %c0_i32 : i32, i32
  }
  func.func @transform_1(%arg0: i32) -> (i32, i32) {
    %c0_i32 = arith.constant 0 : i32
    %c0_i32_0 = arith.constant 0 : i32
    %c0_i32_1 = arith.constant 0 : i32
    return %c0_i32, %c0_i32_0 : i32, i32
  }
  func.func @transform_2(%arg0: i32) -> (i32, i32) {
    %c0_i32 = arith.constant 0 : i32
    %c0_i32_0 = arith.constant 0 : i32
    %c0_i32_1 = arith.constant 0 : i32
    return %c0_i32, %c0_i32_0 : i32, i32
  }
  func.func @transform_3(%arg0: i32) -> (i32, i32) {
    %c0_i32 = arith.constant 0 : i32
    %c0_i32_0 = arith.constant 0 : i32
    %c0_i32_1 = arith.constant 0 : i32
    return %c0_i32, %c0_i32_0 : i32, i32
  }
  func.func @transform_4(%arg0: i32) -> (i32, i32) {
    %c0_i32 = arith.constant 0 : i32
    %c0_i32_0 = arith.constant 0 : i32
    %c0_i32_1 = arith.constant 0 : i32
    return %c0_i32, %c0_i32_0 : i32, i32
  }
  func.func @transform_5(%arg0: i32) -> (i32, i32) {
    %c0_i32 = arith.constant 0 : i32
    %c0_i32_0 = arith.constant 0 : i32
    return %arg0, %c0_i32 : i32, i32
  }
}

</mosaic_0001>

<bundles_post_ra>
// kernel: apply.1
= control target key start
LH: loop header
LB: loop body
LE: loop exit
PB: predicated region body
PF: predicated region fallthrough
CT: control target
= control target key end

     0   :  { %10 = vsyncpa [#allocation3], 0  ;;  %s627_s0 = inlined_call_operand.vmem [shape: f32[16,128], index: 0, kind: input, shape index: {}]   ;;  %s628_s1 = inlined_call_operand.hbm [shape: f32[128,128], index: 1, kind: input, shape index: {}]   ;;  %s629_s2 = inlined_call_operand.vmem [shape: f32[1,128], index: 2, kind: input, shape index: {}]   ;;  %s630_s3 = inlined_call_operand.hbm [shape: f32[128,128], index: 3, kind: input, shape index: {}]   ;;  %s631_s4 = inlined_call_operand.vmem [shape: f32[1,128], index: 4, kind: input, shape index: {}]   ;;  %s632_s5 = inlined_call_operand.vmem [shape: f32[16,128], index: 5, kind: output, shape index: {}]  }
   0x1   :  { %11 = vsyncpa [#allocation5], 0  ;;  %s568_s18 = smov 0  }
   0x2 LB: > { %s169_s21 = sshll.u32 %s628_s1, 4  ;;  %s577_s22 = sadd.s32 4294967295, %s532_s18   ;;  %s532_s18 = sphi %s568_s18, %s17_s18   ;;  %s170_s21 = int_to_ptr.hbm [resolvable:$true] %s169_s21 }
   0x3   : > { %p414_p0 = scmp.ge.s32.totalorder %s532_s18, 1  ;;  %p158_p1 = scmp.lt.s32.totalorder %s532_s18, 3 }
   0x4   : > { %p440_p2 = scmp.eq.s32.totalorder %s577_s22, 0  ;;  %s534_s24 = smov [#allocation2]  }
   0x5   : > { %p582_p3 = pnand %p414_p0, %p158_p1  ;;  %s171_s25 = sshll.u32 %s534_s24, 4  ;;  %s172_s25 = int_to_ptr.vmem [resolvable:$true] %s171_s25 }
   0x6   : > { %s186_s28 = sshll.u32 %s630_s3, 4  ;;  %s535_s29 = smov [#allocation4]   ;;  %s187_s28 = int_to_ptr.hbm [resolvable:$true] %s186_s28 }
   0x7   : > { %p433_p4 = pneg %p582_p3  ;;  %s188_s30 = sshll.u32 %s535_s29, 4  ;;  %s189_s30 = int_to_ptr.vmem [resolvable:$true] %s188_s30 }
   0x8   : > { %s536_s6 = smov 128   ;;  %s537_s7 = smov 8  }
   0x9   : > { %p434_p5 = pnand %p440_p2, %p433_p4  ;;  %214 = sbr.rel (%p582_p3) target bundleno = 308 (0x134), region = 40 }
   0xb   : > { %436 = dma.hbm_to_vmem [thread:$0]  (!%p434_p5), %s170_s21, 2048, %s172_s25, [#allocation3], %s536_s6, %s536_s6, %s537_s7  }
   0xc   : > { %439 = dma.hbm_to_vmem [thread:$0]  (!%p434_p5), %s187_s28, 2048, %s189_s30, [#allocation5], %s536_s6, %s536_s6, %s537_s7  }
   0xe   : > { %523 = dma.done.wait (%p440_p2), [#allocation3], 2048  }
   0xf   : > { %525 = vsyncadd (%p440_p2), [#allocation3], 4294965248 }
  0x10   : > { %527 = dma.done.wait (%p440_p2), [#allocation5], 2048  }
  0x11   : > { %529 = vsyncadd (%p440_p2), [#allocation5], 4294965248  ;;  %v270_v0 = vld [vmem:[#allocation2 + $0x78] sm:$0xff]  ;;  %v269_v1 = vld [vmem:[#allocation2 + $0x70] sm:$0xff]  ;;  %p246_p6 = scmp.lt.s32.totalorder %s577_s22, 1 }
  0x12   : > { %275 = vmatpush.msra.mxu0 %v270_v0  ;;  %v268_v2 = vld [vmem:[#allocation2 + $0x68] sm:$0xff]  ;;  %v267_v3 = vld [vmem:[#allocation2 + $0x60] sm:$0xff]  ;;  %v311_v4 = vld [vmem:[#allocation4 + $0x78] sm:$0xff] }
  0x13   : > { %v266_v5 = vld [vmem:[#allocation2 + $0x58] sm:$0xff]  ;;  %316 = vmatpush.msra.mxu1 %v311_v4  ;;  %v310_v6 = vld [vmem:[#allocation4 + $0x70] sm:$0xff]  ;;  %v309_v7 = vld [vmem:[#allocation4 + $0x68] sm:$0xff]  ;;  %s635_s22 = smov (!%p246_p6, %s577_s22), 1 }
  0x14   : > { %276 = vmatpush.msra.mxu0 %v269_v1  ;;  %v265_v8 = vld [vmem:[#allocation2 + $0x50] sm:$0xff]  ;;  %v308_v9 = vld [vmem:[#allocation4 + $0x60] sm:$0xff]  ;;  %v264_v10 = vld [vmem:[#allocation2 + $0x48] sm:$0xff]  ;;  %s421_s8 = sshll.u32 %s635_s22, 3 }
  0x15   : > { %317 = vmatpush.msra.mxu1 %v310_v6  ;;  %v307_v11 = vld [vmem:[#allocation4 + $0x58] sm:$0xff]  ;;  %v263_v12 = vld [vmem:[#allocation2 + $0x40] sm:$0xff]  ;;  %v306_v13 = vld [vmem:[#allocation4 + $0x50] sm:$0xff]  ;;  %s249_s11 = scalar_lea.vmem %s627_s0, %s421_s8  ;;  %s253_s19 = scalar_lea.vmem %s632_s5, %s421_s8 }
  0x16   : > { %277 = vmatpush.msra.mxu0 %v268_v2  ;;  %v262_v14 = vld [vmem:[#allocation2 + $0x38] sm:$0xff]  ;;  %v305_v15 = vld [vmem:[#allocation4 + $0x48] sm:$0xff]  ;;  %v261_v16 = vld [vmem:[#allocation2 + $0x30] sm:$0xff] }
  0x17   : > { %318 = vmatpush.msra.mxu1 %v309_v7  ;;  %v304_v17 = vld [vmem:[#allocation4 + $0x40] sm:$0xff]  ;;  %v260_v18 = vld [vmem:[#allocation2 + $0x28] sm:$0xff]  ;;  %v303_v19 = vld [vmem:[#allocation4 + $0x38] sm:$0xff] }
  0x18   : > { %278 = vmatpush.msra.mxu0 %v267_v3  ;;  %v259_v20 = vld [vmem:[#allocation2 + $0x20] sm:$0xff]  ;;  %v302_v21 = vld [vmem:[#allocation4 + $0x30] sm:$0xff]  ;;  %v258_v22 = vld [vmem:[#allocation2 + $0x18] sm:$0xff] }
  0x19   : > { %319 = vmatpush.msra.mxu1 %v308_v9  ;;  %v301_v23 = vld [vmem:[#allocation4 + $0x28] sm:$0xff]  ;;  %v257_v24 = vld [vmem:[#allocation2 + $0x10] sm:$0xff]  ;;  %v300_v25 = vld [vmem:[#allocation4 + $0x20] sm:$0xff] }
  0x1a   : > { %279 = vmatpush.msra.mxu0 %v266_v5  ;;  %v256_v26 = vld [vmem:[#allocation2 + $0x8] sm:$0xff]  ;;  %v299_v27 = vld [vmem:[#allocation4 + $0x18] sm:$0xff]  ;;  %v255_v28 = vld [vmem:[#allocation2] sm:$0xff] }
  0x1b   : > { %320 = vmatpush.msra.mxu1 %v307_v11  ;;  %v254_v29 = vld [vmem:[%s249_s11] sm:$0xff]  ;;  %v298_v30 = vld [vmem:[#allocation4 + $0x10] sm:$0xff]  ;;  %v297_v31 = vld [vmem:[#allocation4 + $0x8] sm:$0xff] }
  0x1c   : > { %280 = vmatpush.msra.mxu0 %v265_v8  ;;  %v296_v32 = vld [vmem:[#allocation4] sm:$0xff] }
  0x1d   : > { %321 = vmatpush.msra.mxu1 %v306_v13  ;;  %v456_v33 = vld [vmem:[%s629_s2] ss:$0 sm:$0xff] }
  0x1e   : > { %281 = vmatpush.msra.mxu0 %v264_v10  ;;  %v457_v37 = vld [vmem:[%s631_s4] ss:$0 sm:$0xff] }
  0x1f   : > { %322 = vmatpush.msra.mxu1 %v305_v15 }
  0x20   : > { %282 = vmatpush.msra.mxu0 %v263_v12 }
  0x21   : > { %323 = vmatpush.msra.mxu1 %v304_v17 }
  0x22   : > { %283 = vmatpush.msra.mxu0 %v262_v14 }
  0x23   : > { %324 = vmatpush.msra.mxu1 %v303_v19 }
  0x24   : > { %284 = vmatpush.msra.mxu0 %v261_v16 }
  0x25   : > { %325 = vmatpush.msra.mxu1 %v302_v21 }
  0x26   : > { %285 = vmatpush.msra.mxu0 %v260_v18 }
  0x27   : > { %326 = vmatpush.msra.mxu1 %v301_v23 }
  0x28   : > { %286 = vmatpush.msra.mxu0 %v259_v20 }
  0x29   : > { %327 = vmatpush.msra.mxu1 %v300_v25 }
  0x2a   : > { %287 = vmatpush.msra.mxu0 %v258_v22 }
  0x2b   : > { %328 = vmatpush.msra.mxu1 %v299_v27 }
  0x2c   : > { %288 = vmatpush.msra.mxu0 %v257_v24 }
  0x2d   : > { %329 = vmatpush.msra.mxu1 %v298_v30 }
  0x2e   : > { %289 = vmatpush.msra.mxu0 %v256_v26 }
  0x2f   : > { %330 = vmatpush.msra.mxu1 %v297_v31 }
  0x30   : > { %290 = vmatpush.msra.mxu0 %v255_v28 }
  0x31   : > { %291 = vmatmul.f32.vlgmr.msra.gmra.mxu0 %v254_v29  ;;  %331 = vmatpush.msra.mxu1 %v296_v32 }
  0xae   : > { %v292_v34 = vpop.f32.mrf.mxu0 }
  0xaf   : > { %v293_v35 = vadd.f32 %v456_v33, %v292_v34 }
  0xb1   : > { %v295_v36 = vmax.f32 %v293_v35, 0.0 }
  0xb3   : > { %332 = vmatmul.f32.vlgmr.msra.gmra.mxu1 %v295_v36 }
 0x130   : > { %v333_v38 = vpop.f32.mrf.mxu1 }
 0x131   : > { %v334_v39 = vadd.f32 %v457_v37, %v333_v38 }
 0x133   : > { %336 = vst [vmem:[%s253_s19] sm:$0xff] %v334_v39 }
 0x134 PF: > { %s17_s18 = sadd.s32 1, %s532_s18  }
 0x135   : > { %p14_p7 = scmp.ge.s32.totalorder %s17_s18, 4  }
 0x137   :  { %16 = sbr.rel (!%p14_p7) target bundleno = 2 (0x2), region = 79 }
 0x13c   :  { %356 = vsyncpa [#allocation3], 1 }
 0x13d   :  { %358 = vsyncpa [#allocation3 + $0x1], 1 }
 0x13e   :  { %359 = vsyncpa [#allocation5], 1 }

</bundles_post_ra>
